<compile_context>
chip_gen: v7x
topology: tpu7x:2x2x1
jax: 0.10.0
libtpu: 0.0.40
codegen_flags: <defaults>
</compile_context>

<pallas_src>
import functools

import numpy as np
import jax
import jax.numpy as jnp
from jax.experimental import pallas as pl
from jax.experimental.pallas import tpu as pltpu


# ----------------------------------------------------------------------------
# Pallas kernel: one grid step = one tile of tn rows (flattened batch*seq).
# ----------------------------------------------------------------------------
def keypoint_encoder_kernel(*refs, num_hidden):
    x_ref = refs[0]            # (tn, C0p)
    out_ref = refs[-1]         # (tn, D)
    prm = refs[1:-1]           # per layer: (W_T[, shift]); hidden layers have
                               # BN scale folded into W_T already.

    h = x_ref[...]                                    # (tn, C0p)
    for i in range(num_hidden):                       # static, traced once
        w_t = prm[2 * i][...]                         # (C_in, C_out), scale-folded
        shift = prm[2 * i + 1][...]                   # (1, C_out)  BN shift + conv bias
        h = jnp.dot(h, w_t, preferred_element_type=jnp.float32) + shift
        h = jnp.maximum(h, 0.0)                       # ReLU

    w_t = prm[2 * num_hidden][...]                    # final Conv1d, no BN/ReLU
    b = prm[2 * num_hidden + 1][...]
    out = jnp.dot(h, w_t, preferred_element_type=jnp.float32) + b
    out_ref[...] = out.astype(out_ref.dtype)


# ----------------------------------------------------------------------------
# Wrapper: host-side weight prep (transpose, BN folding) + pallas_call.
# ----------------------------------------------------------------------------
def keypoint_encoder(kpts, scores, layer_params, *, tn=256, eps=1e-5, in_pad=8):
    """kpts: (B, N, 2), scores: (B, N). Returns (B, N, feature_dim)."""
    B, N, _ = kpts.shape
    c0 = 3  # [x, y, score]
    rows = B * N

    # Host-side channel concat (+ zero pad to 8 lanes), flatten batch*seq.
    inp = jnp.concatenate(
        [kpts, scores[..., None], jnp.zeros((B, N, in_pad - c0), kpts.dtype)],
        axis=-1).reshape(rows, in_pad)

    # Pad the row dim to a multiple of the row tile.
    tn = min(tn, max(8, ((rows + 7) // 8) * 8))
    r_pad = (-rows) % tn
    if r_pad:
        inp = jnp.concatenate(
            [inp, jnp.zeros((r_pad, in_pad), inp.dtype)], axis=0)
    rows_padded = rows + r_pad
    n_tiles = rows_padded // tn

    num_hidden = len(layer_params) - 1

    # TODO(synk): training-mode BatchNorm (batch statistics) not implemented;
    # eval-mode running stats are folded into the conv weights / shift.
    flat = []
    for i, lay in enumerate(layer_params):
        w = lay["w"]                                        # (C_out, C_in)
        if i == 0:                                          # pad input channels
            w = jnp.concatenate(
                [w, jnp.zeros((w.shape[0], in_pad - w.shape[1]), w.dtype)],
                axis=1)
        if i < num_hidden:
            scale = lay["gamma"] / jnp.sqrt(lay["var"] + eps)
            shift = lay["beta"] + (lay["b"] - lay["mean"]) * scale
            w_t = (w * scale[:, None]).T                    # fold BN scale into W
            flat += [w_t.astype(inp.dtype), shift[None, :].astype(inp.dtype)]
        else:
            flat += [w.T.astype(inp.dtype), lay["b"][None, :].astype(inp.dtype)]

    d_out = layer_params[-1]["w"].shape[0]

    def full_spec(a):
        nd = a.ndim
        return pl.BlockSpec(a.shape, lambda n, _nd=nd: (0,) * _nd)

    kernel = functools.partial(keypoint_encoder_kernel, num_hidden=num_hidden)
    out = pl.pallas_call(
        kernel,
        out_shape=jax.ShapeDtypeStruct((rows_padded, d_out), inp.dtype),
        grid=(n_tiles,),
        in_specs=[pl.BlockSpec((tn, in_pad), lambda n: (n, 0))]
                 + [full_spec(a) for a in flat],
        out_specs=pl.BlockSpec((tn, d_out), lambda n: (n, 0)),
        compiler_params=pltpu.CompilerParams(
            dimension_semantics=("parallel",)),
    )(inp, *flat)
    return out[:rows].reshape(B, N, d_out)


# ----------------------------------------------------------------------------
# Pure-JAX reference replicating the PyTorch forward (NCW layout, einsums).
# ----------------------------------------------------------------------------
def reference(kpts, scores, layer_params, eps=1e-5):
    x = jnp.concatenate(
        [jnp.transpose(kpts, (0, 2, 1)), scores[:, None, :]], axis=1)  # (B, 3, N)
    n_layers = len(layer_params)
    for i, lay in enumerate(layer_params):
        x = jnp.einsum("oc,bcn->bon", lay["w"], x) + lay["b"][None, :, None]
        if i < n_layers - 1:
            scale = lay["gamma"] / jnp.sqrt(lay["var"] + eps)
            shift = lay["beta"] - lay["mean"] * scale
            x = jnp.maximum(x * scale[None, :, None] + shift[None, :, None], 0.0)
    return x


if __name__ == "__main__":
    # Small but representative config: encoder channels [3, 32, 64, 128].
    B, N = 2, 200                  # N not a multiple of the tile -> exercises padding
    layers = [32, 64]
    feature_dim = 128              # lane-dense (multiple of 128) output channels
    channels = [3] + layers + [feature_dim]

    key = jax.random.PRNGKey(0)
    keys = iter(jax.random.split(key, 64))
    init = lambda shape: (0.1 * jax.random.normal(next(keys), shape)).astype(jnp.float32)

    layer_params = []
    n_layers = len(channels) - 1
    for i in range(n_layers):
        c_in, c_out = channels[i], channels[i + 1]
        lay = {"w": init((c_out, c_in))}
        if i < n_layers - 1:
            lay["b"] = init((c_out,))
            lay["gamma"] = 1.0 + init((c_out,))
            lay["beta"] = init((c_out,))
            lay["mean"] = init((c_out,))
            lay["var"] = jnp.abs(init((c_out,))) + 0.5
        else:
            # nn.init.constant_(self.encoder[-1].bias, 0.0)
            lay["b"] = jnp.zeros((c_out,), jnp.float32)
        layer_params.append(lay)

    kpts = init((B, N, 2)) * 10.0        # keypoint coordinates
    scores = jnp.abs(init((B, N)))       # detection scores

    out_bnd = keypoint_encoder(kpts, scores, layer_params)      # (B, N, D)
    out_bnd = jax.block_until_ready(out_bnd)
    out_bdn = jnp.transpose(out_bnd, (0, 2, 1))                  # PyTorch (B, D, N)

    ref_bdn = reference(kpts, scores, layer_params)
    np.testing.assert_allclose(np.asarray(out_bdn), np.asarray(ref_bdn),
                               rtol=1e-4, atol=1e-4)
    print("KERNEL_OK")
</pallas_src>

<mosaic_0001>
module attributes {stable_mosaic.version = 11 : i64} {
  func.func @keypoint_encoder_kernel(%arg0: i32, %arg1: memref<256x8xf32, #tpu.memory_space<vmem>>, %arg2: memref<8x32xf32, #tpu.memory_space<vmem>>, %arg3: memref<1x32xf32, #tpu.memory_space<vmem>>, %arg4: memref<32x64xf32, #tpu.memory_space<vmem>>, %arg5: memref<1x64xf32, #tpu.memory_space<vmem>>, %arg6: memref<64x128xf32, #tpu.memory_space<vmem>>, %arg7: memref<1x128xf32, #tpu.memory_space<vmem>>, %arg8: memref<256x128xf32, #tpu.memory_space<vmem>>) attributes {dimension_semantics = [#tpu.dimension_semantics<parallel>], iteration_bounds = array<i64: 2>, scalar_prefetch = 0 : i64, scratch_operands = 0 : i64, tpu.core_type = #tpu.core_type<tc>, window_params = [{transform_indices = @transform_0, window_bounds = array<i64: 256, 8>}, {pipeline_mode = #tpu.pipeline_mode<synchronous>, transform_indices = @transform_1, window_bounds = array<i64: 8, 32>}, {pipeline_mode = #tpu.pipeline_mode<synchronous>, transform_indices = @transform_2, window_bounds = array<i64: 1, 32>}, {pipeline_mode = #tpu.pipeline_mode<synchronous>, transform_indices = @transform_3, window_bounds = array<i64: 32, 64>}, {pipeline_mode = #tpu.pipeline_mode<synchronous>, transform_indices = @transform_4, window_bounds = array<i64: 1, 64>}, {pipeline_mode = #tpu.pipeline_mode<synchronous>, transform_indices = @transform_5, window_bounds = array<i64: 64, 128>}, {pipeline_mode = #tpu.pipeline_mode<synchronous>, transform_indices = @transform_6, window_bounds = array<i64: 1, 128>}, {transform_indices = @transform_7, window_bounds = array<i64: 256, 128>}]} {
    %c0 = arith.constant 0 : index
    %c0_0 = arith.constant 0 : index
    %0 = vector.load %arg1[%c0, %c0_0] : memref<256x8xf32, #tpu.memory_space<vmem>>, vector<256x8xf32>
    %c0_1 = arith.constant 0 : index
    %c0_2 = arith.constant 0 : index
    %1 = vector.load %arg2[%c0_1, %c0_2] : memref<8x32xf32, #tpu.memory_space<vmem>>, vector<8x32xf32>
    %c0_3 = arith.constant 0 : index
    %c0_4 = arith.constant 0 : index
    %2 = vector.load %arg3[%c0_3, %c0_4] : memref<1x32xf32, #tpu.memory_space<vmem>>, vector<1x32xf32>
    %cst = arith.constant dense<0.000000e+00> : vector<256x32xf32>
    %3 = tpu.matmul %0, %1, %cst {dimension_numbers = #tpu.dot_dimension_numbers<[1], [0], [0], [1], [0, 0, 1, 1], [], []>} : vector<256x8xf32>, vector<8x32xf32>, vector<256x32xf32> -> vector<256x32xf32>
    %4 = vector.broadcast %2 : vector<1x32xf32> to vector<256x32xf32>
    %5 = arith.addf %3, %4 : vector<256x32xf32>
    %cst_5 = arith.constant 0.000000e+00 : f32
    %6 = vector.broadcast %cst_5 : f32 to vector<256x32xf32>
    %7 = arith.maximumf %5, %6 : vector<256x32xf32>
    %c0_6 = arith.constant 0 : index
    %c0_7 = arith.constant 0 : index
    %8 = vector.load %arg4[%c0_6, %c0_7] : memref<32x64xf32, #tpu.memory_space<vmem>>, vector<32x64xf32>
    %c0_8 = arith.constant 0 : index
    %c0_9 = arith.constant 0 : index
    %9 = vector.load %arg5[%c0_8, %c0_9] : memref<1x64xf32, #tpu.memory_space<vmem>>, vector<1x64xf32>
    %cst_10 = arith.constant dense<0.000000e+00> : vector<256x64xf32>
    %10 = tpu.matmul %7, %8, %cst_10 {dimension_numbers = #tpu.dot_dimension_numbers<[1], [0], [0], [1], [0, 0, 1, 1], [], []>} : vector<256x32xf32>, vector<32x64xf32>, vector<256x64xf32> -> vector<256x64xf32>
    %11 = vector.broadcast %9 : vector<1x64xf32> to vector<256x64xf32>
    %12 = arith.addf %10, %11 : vector<256x64xf32>
    %cst_11 = arith.constant 0.000000e+00 : f32
    %13 = vector.broadcast %cst_11 : f32 to vector<256x64xf32>
    %14 = arith.maximumf %12, %13 : vector<256x64xf32>
    %c0_12 = arith.constant 0 : index
    %c0_13 = arith.constant 0 : index
    %15 = vector.load %arg6[%c0_12, %c0_13] : memref<64x128xf32, #tpu.memory_space<vmem>>, vector<64x128xf32>
    %c0_14 = arith.constant 0 : index
    %c0_15 = arith.constant 0 : index
    %16 = vector.load %arg7[%c0_14, %c0_15] : memref<1x128xf32, #tpu.memory_space<vmem>>, vector<1x128xf32>
    %cst_16 = arith.constant dense<0.000000e+00> : vector<256x128xf32>
    %17 = tpu.matmul %14, %15, %cst_16 {dimension_numbers = #tpu.dot_dimension_numbers<[1], [0], [0], [1], [0, 0, 1, 1], [], []>} : vector<256x64xf32>, vector<64x128xf32>, vector<256x128xf32> -> vector<256x128xf32>
    %18 = vector.broadcast %16 : vector<1x128xf32> to vector<256x128xf32>
    %19 = arith.addf %17, %18 : vector<256x128xf32>
    %c0_17 = arith.constant 0 : index
    %c0_18 = arith.constant 0 : index
    %20 = vector.load %arg8[%c0_17, %c0_18] : memref<256x128xf32, #tpu.memory_space<vmem>>, vector<256x128xf32>
    tpu.vector_store %arg8[%c0_17, %c0_18], %19 {strides = array<i32>} : memref<256x128xf32, #tpu.memory_space<vmem>>, vector<256x128xf32>,
    return
  }
  func.func @transform_0(%arg0: i32) -> (i32, i32) {
    %c0_i32 = arith.constant 0 : i32
    %c0_i32_0 = arith.constant 0 : i32
    return %arg0, %c0_i32 : i32, i32
  }
  func.func @transform_1(%arg0: i32) -> (i32, i32) {
    %c0_i32 = arith.constant 0 : i32
    %c0_i32_0 = arith.constant 0 : i32
    %c0_i32_1 = arith.constant 0 : i32
    return %c0_i32, %c0_i32_0 : i32, i32
  }
  func.func @transform_2(%arg0: i32) -> (i32, i32) {
    %c0_i32 = arith.constant 0 : i32
    %c0_i32_0 = arith.constant 0 : i32
    %c0_i32_1 = arith.constant 0 : i32
    return %c0_i32, %c0_i32_0 : i32, i32
  }
  func.func @transform_3(%arg0: i32) -> (i32, i32) {
    %c0_i32 = arith.constant 0 : i32
    %c0_i32_0 = arith.constant 0 : i32
    %c0_i32_1 = arith.constant 0 : i32
    return %c0_i32, %c0_i32_0 : i32, i32
  }
  func.func @transform_4(%arg0: i32) -> (i32, i32) {
    %c0_i32 = arith.constant 0 : i32
    %c0_i32_0 = arith.constant 0 : i32
    %c0_i32_1 = arith.constant 0 : i32
    return %c0_i32, %c0_i32_0 : i32, i32
  }
  func.func @transform_5(%arg0: i32) -> (i32, i32) {
    %c0_i32 = arith.constant 0 : i32
    %c0_i32_0 = arith.constant 0 : i32
    %c0_i32_1 = arith.constant 0 : i32
    return %c0_i32, %c0_i32_0 : i32, i32
  }
  func.func @transform_6(%arg0: i32) -> (i32, i32) {
    %c0_i32 = arith.constant 0 : i32
    %c0_i32_0 = arith.constant 0 : i32
    %c0_i32_1 = arith.constant 0 : i32
    return %c0_i32, %c0_i32_0 : i32, i32
  }
  func.func @transform_7(%arg0: i32) -> (i32, i32) {
    %c0_i32 = arith.constant 0 : i32
    %c0_i32_0 = arith.constant 0 : i32
    return %arg0, %c0_i32 : i32, i32
  }
}

</mosaic_0001>

<bundles_post_ra>
// kernel: tpu_custom_call.1
= control target key start
LH: loop header
LB: loop body
LE: loop exit
PB: predicated region body
PF: predicated region fallthrough
CT: control target
= control target key end

     0   :  { %12 = vsyncpa [#allocation3], 0  ;;  %s2479_s0 = inlined_call_operand.vmem [shape: f32[512,8], index: 0, kind: input, shape index: {}]   ;;  %s2480_s1 = inlined_call_operand.vmem [shape: f32[8,32], index: 1, kind: input, shape index: {}]   ;;  %s2481_s2 = inlined_call_operand.vmem [shape: f32[1,32], index: 2, kind: input, shape index: {}]   ;;  %s2482_s3 = inlined_call_operand.vmem [shape: f32[32,64], index: 3, kind: input, shape index: {}]   ;;  %s2483_s4 = inlined_call_operand.vmem [shape: f32[1,64], index: 4, kind: input, shape index: {}]   ;;  %s2484_s5 = inlined_call_operand.vmem [shape: f32[64,128], index: 5, kind: input, shape index: {}]   ;;  %s2485_s6 = inlined_call_operand.vmem [shape: f32[1,128], index: 6, kind: input, shape index: {}]   ;;  %s2486_s7 = inlined_call_operand.hbm [shape: f32[512,128], index: 7, kind: output, shape index: {}]  }
   0x1   :  { %14 = vsyncpa [#allocation3 + $0x1], 0  ;;  %s2049_s24 = smov 0   ;;  %s2051_s25 = smov 0  }
   0x2   :  { %s2053_s26 = smov 0   ;;  %s2055_s27 = smov 0  }
   0x3 LB: > { %s2070_s28 = sadd.s32 4294967295, %s2004_s27   ;;  %s1484_s29 = sadd.s32 4294967294, %s2004_s27   ;;  %s2004_s27 = sphi %s2055_s27, %s2492_s27   ;;  %s2000_s26 = sphi %s2053_s26, %s2491_s26   ;;  %s1996_s25 = sphi %s2051_s25, %s2490_s25   ;;  %s1992_s24 = sphi %s2049_s24, %s2489_s24  }
   0x4   : > { %s2074_s30 = sadd.s32 1, %s2004_s27   ;;  %s179_s8 = sadd.s32 1, %s2000_s26 }
   0x5   : > { %s176_s9 = ssub.s32 %s2004_s27, %s2074_s30  ;;  %p189_p0 = scmp.ne.s32.totalorder %s2000_s26, %s1996_s25 }
   0x6   : > { %p177_p1 = scmp.eq.s32.totalorder %s176_s9, 0  ;;  %p190_p2 = scmp.eq.s32.totalorder %s2070_s28, 1 }
   0x7   : > { %p195_p3 = scmp.ne.s32.totalorder %s1996_s25, %s1992_s24  ;;  %p196_p4 = scmp.eq.s32.totalorder %s1484_s29, 1 }
   0x8   : > { %s2085_s10 = scalar_select %p177_p1, %s2000_s26, %s179_s8  }
   0x9   : > { %p2087_p5 = por %p190_p2, %p189_p0  ;;  %p2091_p6 = por %p196_p4, %p195_p3 }
   0xa   : > { %p1487_p7 = scmp.ge.s32.totalorder %s2004_s27, 1  ;;  %p241_p8 = scmp.lt.s32.totalorder %s2004_s27, 3 }
   0xc   : > { %p242_p9 = pnand %p1487_p7, %p241_p8 }
   0xd   : > { %v312_v0 = vld [vmem:[%s2480_s1] sm:$0xff] (!%p242_p9)  ;;  %s1489_s15 = sshll.u32 (!%p242_p9), %s2070_s28, 5  ;;  %v675_v2 = vld [vmem:[%s2482_s3 + $0x8] sm:$0xff] (!%p242_p9)  ;;  %vm320_vm0 = vcmask (!%p242_p9), 64512   ;;  %v676_v7 = vld [vmem:[%s2482_s3 + $0x10] sm:$0xff] (!%p242_p9)  ;;  %vm685_vm1 = vcmask (!%p242_p9), 261120  }
   0xe   : > { %245 = sbr.rel (%p242_p9) target bundleno = 752 (0x2f0), region = 48  ;;  %v674_v1 = vld [vmem:[%s2482_s3] sm:$0xff] (!%p242_p9)  ;;  %1705 = vmatprep.subr.mxu0 (!%p242_p9), %v312_v0  ;;  %p274_p10 = scmp.lt.s32.totalorder (!%p242_p9), %s1489_s15, 63  ;;  %1899 = vmatprep.subr.mxu1 (!%p242_p9), %v312_v0  ;;  %v677_v8 = vld [vmem:[%s2482_s3 + $0x18] sm:$0xff] (!%p242_p9)  ;;  %v1040_v40 = vld [vmem:[%s2484_s5 + $0x8] sm:$0xff] (!%p242_p9)  ;;  %vm1054_vm2 = vcmask (!%p242_p9), 523264  }
   0xf   : > { %v1875_v3 = vpack.c.bf16 (!%p242_p9), %v675_v2, %v674_v1  ;;  %1706 = vmatpush3.msra.mxu0 (!%p242_p9), %v312_v0  ;;  %1900 = vmatpush3.msra.mxu1 (!%p242_p9), %v312_v0  ;;  %v1879_v13 = vpack.c.bf16 (!%p242_p9), %v677_v8, %v676_v7  ;;  %v1039_v39 = vld [vmem:[%s2484_s5] sm:$0xff] (!%p242_p9)  ;;  %v1041_v41 = vld [vmem:[%s2484_s5 + $0x10] sm:$0xff] (!%p242_p9)  ;;  %v1042_v43 = vld [vmem:[%s2484_s5 + $0x18] sm:$0xff] (!%p242_p9)  ;;  %s1595_s8 = sshll.u32 (!%p242_p9), %s2070_s28, 12  ;;  %s2006_s17 = smov (!%p242_p9), [#allocation2]  }
  0x10   : > { %v1883_v42 = vpack.c.bf16 (!%p242_p9), %v1040_v40, %v1039_v39  ;;  %v1887_v44 = vpack.c.bf16 (!%p242_p9), %v1042_v43, %v1041_v41  ;;  %v1043_v45 = vld [vmem:[%s2484_s5 + $0x20] sm:$0xff] (!%p242_p9)  ;;  %v1044_v46 = vld [vmem:[%s2484_s5 + $0x28] sm:$0xff] (!%p242_p9)  ;;  %v1045_v48 = vld [vmem:[%s2484_s5 + $0x30] sm:$0xff] (!%p242_p9)  ;;  %s1946_s18 = sshll.u32 (!%p242_p9), %s2006_s17, 4  ;;  %s1947_s18 = int_to_ptr.vmem [resolvable:$false] %s1946_s18 }
  0x11   : > { %1876 = vmatprep.subr.bf16.mxu1 (!%p242_p9), %v1875_v3  ;;  %v1891_v47 = vpack.c.bf16 (!%p242_p9), %v1044_v46, %v1043_v45  ;;  %v1046_v49 = vld [vmem:[%s2484_s5 + $0x38] sm:$0xff] (!%p242_p9)  ;;  %v2209_v51 = vld [vmem:[%s2481_s2] ss:$0 sm:$0xff] (!%p242_p9)  ;;  %s1948_s19 = scalar_lea.vmem (!%p242_p9), %s1947_s18, 8192 }
  0x12   : > { %1884 = vmatprep.subr.bf16.mxu0 (!%p242_p9), %v1883_v42  ;;  %v1895_v50 = vpack.c.bf16 (!%p242_p9), %v1046_v49, %v1045_v48 }
  0x15   : > { %s2494_s15 = smov (!%p274_p10, %s1489_s15), 63 }
  0x16   : > { %s1490_s20 = sshll.u32 %s2494_s15, 3  ;;  %s2429_s15 = scalar_lea.hbm %s2486_s7, %s1595_s8 }
  0x17   : > { %s2110_s23 = scalar_lea.vmem %s2479_s0, %s1490_s20  ;;  %s270_s20 = sand.u32 1, %s1996_s25  }
  0x18   : > { %v280_v4 = vld [vmem:[%s2110_s23] sm:$0xff]  ;;  %v281_v5 = vld [vmem:[%s2110_s23 + $0x8] sm:$0xff]  ;;  %v282_v6 = vld [vmem:[%s2110_s23 + $0x10] sm:$0xff]  ;;  %s1488_s21 = sshll.u32 %s270_s20, 8  ;;  %s2438_s28 = scalar_lea.sflag [#allocation3], %s270_s20 }
  0x19   : > { %1707 = vmatprep.mubr.msk.f32.mxu0 %vm320_vm0, %v280_v4  ;;  %v283_v9 = vld [vmem:[%s2110_s23 + $0x18] sm:$0xff]  ;;  %v284_v10 = vld [vmem:[%s2110_s23 + $0x20] sm:$0xff]  ;;  %v297_v12 = vld [vmem:[%s2110_s23 + $0x88] sm:$0xff]  ;;  %s2363_s29 = scalar_lea.vmem [#allocation2], %s1488_s21 }
  0x1a   : > { %1708 = vmatmul.mubr.msk.f32.vlgmr.msra.gmra.mrb[0].mxu0 %vm320_vm0, %v281_v5  ;;  %v296_v11 = vld [vmem:[%s2110_s23 + $0x80] sm:$0xff]  ;;  %v298_v14 = vld [vmem:[%s2110_s23 + $0x90] sm:$0xff]  ;;  %v285_v15 = vld [vmem:[%s2110_s23 + $0x28] sm:$0xff]  ;;  %s1422_s9 = sshll.u32 %s2363_s29, 4  ;;  %s2431_s9 = int_to_ptr.vmem [resolvable:$true] %s1422_s9 }
  0x1b   : > { %1710 = vmatprep.mubr.msk.f32.mxu0 %vm320_vm0, %v282_v6  ;;  %1731 = vmatprep.mubr.msk.f32.mxu1 %vm320_vm0, %v296_v11  ;;  %v286_v16 = vld [vmem:[%s2110_s23 + $0x30] sm:$0xff]  ;;  %v299_v17 = vld [vmem:[%s2110_s23 + $0x98] sm:$0xff]  ;;  %v300_v18 = vld [vmem:[%s2110_s23 + $0xa0] sm:$0xff]  ;;  %s1942_s16 = scalar_lea.vmem %s2431_s9, 4096  ;;  %p1949_p0 = scmp.lt.s32.totalorder %s2431_s9, %s1947_s18 }
  0x1c   : > { %1732 = vmatmul.mubr.msk.f32.vlgmr.msra.gmra.mrb[0].mxu1 %vm320_vm0, %v297_v12  ;;  %v287_v19 = vld [vmem:[%s2110_s23 + $0x38] sm:$0xff]  ;;  %v288_v20 = vld [vmem:[%s2110_s23 + $0x40] sm:$0xff]  ;;  %v301_v21 = vld [vmem:[%s2110_s23 + $0xa8] sm:$0xff]  ;;  %1886 = vmatpush3.bf16.msra.mxu0 %v1883_v42  ;;  %p1943_p11 = scmp.ne.s32.totalorder %s2431_s9, %s1942_s16  ;;  %p1950_p1 = scmp.lt.s32.totalorder %s1948_s19, %s1942_s16 }
  0x1d   : > { %1734 = vmatprep.mubr.msk.f32.mxu1 %vm320_vm0, %v298_v14  ;;  %1878 = vmatpush3.bf16.msra.mxu1 %v1875_v3  ;;  %v302_v22 = vld [vmem:[%s2110_s23 + $0xb0] sm:$0xff]  ;;  %v289_v23 = vld [vmem:[%s2110_s23 + $0x48] sm:$0xff]  ;;  %v303_v25 = vld [vmem:[%s2110_s23 + $0xb8] sm:$0xff] }
  0x1e   : > { %1711 = vmatmul.mubr.msk.f32.gmra.mrb[2].mxu0 %vm320_vm0, %v283_v9  ;;  %1880 = vmatprep.subr.bf16.mxu1 %v1879_v13  ;;  %v290_v24 = vld [vmem:[%s2110_s23 + $0x50] sm:$0xff]  ;;  %v304_v26 = vld [vmem:[%s2110_s23 + $0xc0] sm:$0xff]  ;;  %v291_v27 = vld [vmem:[%s2110_s23 + $0x58] sm:$0xff]  ;;  %p1944_p12 = pnand %p1943_p11, %p2087_p5  ;;  %p1951_p2 = por %p1950_p1, %p1949_p0 }
  0x1f   : > { %1713 = vmatprep.mubr.msk.f32.mxu0 %vm320_vm0, %v284_v10  ;;  %v292_v28 = vld [vmem:[%s2110_s23 + $0x60] sm:$0xff]  ;;  %v305_v29 = vld [vmem:[%s2110_s23 + $0xc8] sm:$0xff]  ;;  %v306_v30 = vld [vmem:[%s2110_s23 + $0xd0] sm:$0xff]  ;;  %1888 = vmatprep.subr.bf16.mxu0 %v1887_v44 }
  0x20   : > { %1735 = vmatmul.mubr.msk.f32.gmra.mrb[2].mxu1 %vm320_vm0, %v299_v17  ;;  %v293_v31 = vld [vmem:[%s2110_s23 + $0x68] sm:$0xff]  ;;  %v294_v32 = vld [vmem:[%s2110_s23 + $0x70] sm:$0xff]  ;;  %v307_v33 = vld [vmem:[%s2110_s23 + $0xd8] sm:$0xff]  ;;  %1890 = vmatpush3.bf16.msra.mxu0 %v1887_v44  ;;  %p1945_p13 = pneg %p1944_p12 }
  0x21   : > { %1737 = vmatprep.mubr.msk.f32.mxu1 %vm320_vm0, %v300_v18  ;;  %1882 = vmatpush3.bf16.msra.mxu1 %v1879_v13  ;;  %v308_v34 = vld [vmem:[%s2110_s23 + $0xe0] sm:$0xff]  ;;  %v295_v35 = vld [vmem:[%s2110_s23 + $0x78] sm:$0xff]  ;;  %v309_v36 = vld [vmem:[%s2110_s23 + $0xe8] sm:$0xff] }
  0x22   : > { %1714 = vmatmul.mubr.msk.f32.gmra.mrb[4].mxu0 %vm320_vm0, %v285_v15  ;;  %v310_v37 = vld [vmem:[%s2110_s23 + $0xf0] sm:$0xff]  ;;  %v311_v38 = vld [vmem:[%s2110_s23 + $0xf8] sm:$0xff]  ;;  %1892 = vmatprep.subr.bf16.mxu0 %v1891_v47  ;;  %p1952_p3 = pnand %p1951_p2, %p1945_p13 }
  0x23   : > { %1716 = vmatprep.mubr.msk.f32.mxu0 %vm320_vm0, %v286_v16 }
  0x24   : > { %1738 = vmatmul.mubr.msk.f32.gmra.mrb[4].mxu1 %vm320_vm0, %v301_v21  ;;  %1894 = vmatpush3.bf16.msra.mxu0 %v1891_v47 }
  0x25   : > { %1740 = vmatprep.mubr.msk.f32.mxu1 %vm320_vm0, %v302_v22  ;;  %1896 = vmatprep.subr.bf16.mxu0 %v1895_v50 }
  0x26   : > { %1717 = vmatmul.mubr.msk.f32.gmra.mrb[6].mxu0 %vm320_vm0, %v287_v19 }
  0x27   : > { %1719 = vmatprep.mubr.msk.f32.mxu0 %vm320_vm0, %v288_v20 }
  0x28   : > { %1741 = vmatmul.mubr.msk.f32.gmra.mrb[6].mxu1 %vm320_vm0, %v303_v25  ;;  %1898 = vmatpush3.bf16.msra.mxu0 %v1895_v50 }
  0x29   : > { %1743 = vmatprep.mubr.msk.f32.mxu1 %vm320_vm0, %v304_v26 }
  0x2a   : > { %1720 = vmatmul.mubr.msk.f32.gmra.mrb[8].mxu0 %vm320_vm0, %v289_v23 }
  0x2b   : > { %1722 = vmatprep.mubr.msk.f32.mxu0 %vm320_vm0, %v290_v24 }
  0x2c   : > { %1744 = vmatmul.mubr.msk.f32.gmra.mrb[8].mxu1 %vm320_vm0, %v305_v29 }
  0x2d   : > { %1746 = vmatprep.mubr.msk.f32.mxu1 %vm320_vm0, %v306_v30 }
  0x2e   : > { %1723 = vmatmul.mubr.msk.f32.gmra.mrb[10].mxu0 %vm320_vm0, %v291_v27 }
  0x2f   : > { %1725 = vmatprep.mubr.msk.f32.mxu0 %vm320_vm0, %v292_v28 }
  0x30   : > { %1747 = vmatmul.mubr.msk.f32.gmra.mrb[10].mxu1 %vm320_vm0, %v307_v33 }
  0x31   : > { %1749 = vmatprep.mubr.msk.f32.mxu1 %vm320_vm0, %v308_v34 }
  0x32   : > { %1726 = vmatmul.mubr.msk.f32.gmra.mrb[12].mxu0 %vm320_vm0, %v293_v31 }
  0x33   : > { %1728 = vmatprep.mubr.msk.f32.mxu0 %vm320_vm0, %v294_v32 }
  0x34   : > { %1750 = vmatmul.mubr.msk.f32.gmra.mrb[12].mxu1 %vm320_vm0, %v309_v36 }
  0x35   : > { %1752 = vmatprep.mubr.msk.f32.mxu1 %vm320_vm0, %v310_v37 }
  0x36   : > { %1729 = vmatmul.mubr.msk.f32.gmra.mrb[14].mxu0 %vm320_vm0, %v295_v35 }
  0x38   : > { %1753 = vmatmul.mubr.msk.f32.gmra.mrb[14].mxu1 %vm320_vm0, %v311_v38 }
  0xed   : > { %v1709_v52 = vpop.f32.mrb[0].mxu0 }
  0xee   : > { %v489_v53 = vadd.f32 %v1709_v52, %v2209_v51  ;;  %v483_v54 = vpop.f32.mrb[1].mxu0 }
  0xef   : > { %v484_v55 = vadd.f32 %v2209_v51, %v483_v54  ;;  %v2214_v61 = vpop.f32.mrb[0].mxu1 }
  0xf0   : > { %v643_v58 = vmax.f32 %v489_v53, 0.0  ;;  %v563_v63 = vpop.f32.mrb[1].mxu1  ;;  %v569_v54 = vadd.f32 %v2214_v61, %v2209_v51 }
  0xf1   : > { %v642_v56 = vmax.f32 %v484_v55, 0.0  ;;  %v1712_v57 = vpop.f32.mrb[2].mxu0  ;;  %v564_v42 = vadd.f32 %v2209_v51, %v563_v63 }
  0xf2   : > { %v499_v59 = vadd.f32 %v1712_v57, %v2209_v51  ;;  %v493_v60 = vpop.f32.mrb[3].mxu0 }
  0xf3   : > { %v494_v62 = vadd.f32 %v2209_v51, %v493_v60  ;;  %1763 = vmatprep.mubr.msk.f32.mxu1 %vm685_vm1, %v642_v56  ;;  %v2220_v5 = vpop.f32.mrb[2].mxu1  ;;  %v658_v50 = vmax.f32 %v564_v42, 0.0 }
  0xf4   : > { %1764 = vmatmul.mubr.msk.f32.vlgmr.msra.gmra.mrb[16].mxu1 %vm685_vm1, %v643_v58  ;;  %v645_v2 = vmax.f32 %v499_v59, 0.0  ;;  %v573_v7 = vpop.f32.mrb[3].mxu1  ;;  %v659_v59 = vmax.f32 %v569_v54, 0.0  ;;  %v579_v60 = vadd.f32 %v2220_v5, %v2209_v51 }
  0xf5   : > { %v644_v0 = vmax.f32 %v494_v62, 0.0  ;;  %v1715_v1 = vpop.f32.mrb[4].mxu0  ;;  %v574_v52 = vadd.f32 %v2209_v51, %v573_v7 }
  0xf6   : > { %v509_v3 = vadd.f32 %v1715_v1, %v2209_v51  ;;  %v503_v4 = vpop.f32.mrb[5].mxu0  ;;  %v661_v63 = vmax.f32 %v579_v60, 0.0 }
  0xf7   : > { %v504_v6 = vadd.f32 %v2209_v51, %v503_v4  ;;  %1766 = vmatprep.mubr.msk.f32.mxu1 %vm685_vm1, %v644_v0  ;;  %v2226_v13 = vpop.f32.mrb[4].mxu1  ;;  %v660_v57 = vmax.f32 %v574_v52, 0.0 }
  0xf8   : > { %1767 = vmatmul.mubr.msk.f32.gmra.mrb[18].mxu1 %vm685_vm1, %v645_v2  ;;  %v647_v10 = vmax.f32 %v509_v3, 0.0  ;;  %v583_v15 = vpop.f32.mrb[5].mxu1  ;;  %v589_v0 = vadd.f32 %v2226_v13, %v2209_v51 }
  0xf9   : > { %v646_v8 = vmax.f32 %v504_v6, 0.0  ;;  %v1718_v9 = vpop.f32.mrb[6].mxu0  ;;  %v584_v58 = vadd.f32 %v2209_v51, %v583_v15 }
  0xfa   : > { %v519_v11 = vadd.f32 %v1718_v9, %v2209_v51  ;;  %v513_v12 = vpop.f32.mrb[7].mxu0  ;;  %v663_v3 = vmax.f32 %v589_v0, 0.0 }
  0xfb   : > { %v514_v14 = vadd.f32 %v2209_v51, %v513_v12  ;;  %1769 = vmatprep.mubr.msk.f32.mxu1 %vm685_vm1, %v646_v8  ;;  %v1742_v21 = vpop.f32.mrb[6].mxu1  ;;  %v662_v62 = vmax.f32 %v584_v58, 0.0 }
  0xfc   : > { %1770 = vmatmul.mubr.msk.f32.gmra.mrb[20].mxu1 %vm685_vm1, %v647_v10  ;;  %v649_v18 = vmax.f32 %v519_v11, 0.0  ;;  %v593_v23 = vpop.f32.mrb[7].mxu1  ;;  %v599_v4 = vadd.f32 %v1742_v21, %v2209_v51  ;;  %v2287_v21 = vld [vmem:[%s2483_s4] ss:$0 sm:$0xff] }
  0xfd   : > { %v648_v16 = vmax.f32 %v514_v14, 0.0  ;;  %v1721_v17 = vpop.f32.mrb[8].mxu0  ;;  %v594_v61 = vadd.f32 %v2209_v51, %v593_v23 }
  0xfe   : > { %v529_v19 = vadd.f32 %v1721_v17, %v2209_v51  ;;  %v523_v20 = vpop.f32.mrb[9].mxu0  ;;  %v665_v7 = vmax.f32 %v599_v4, 0.0 }
  0xff   : > { %v524_v22 = vadd.f32 %v2209_v51, %v523_v20  ;;  %1772 = vmatprep.mubr.msk.f32.mxu1 %vm685_vm1, %v648_v16  ;;  %v1745_v29 = vpop.f32.mrb[8].mxu1  ;;  %v664_v1 = vmax.f32 %v594_v61, 0.0 }
 0x100   : > { %1773 = vmatmul.mubr.msk.f32.gmra.mrb[22].mxu1 %vm685_vm1, %v649_v18  ;;  %v651_v26 = vmax.f32 %v529_v19, 0.0  ;;  %v603_v31 = vpop.f32.mrb[9].mxu1  ;;  %v609_v8 = vadd.f32 %v1745_v29, %v2209_v51 }
 0x101   : > { %v650_v24 = vmax.f32 %v524_v22, 0.0  ;;  %v1724_v25 = vpop.f32.mrb[10].mxu0  ;;  %v604_v2 = vadd.f32 %v2209_v51, %v603_v31 }
 0x102   : > { %v539_v27 = vadd.f32 %v1724_v25, %v2209_v51  ;;  %v533_v28 = vpop.f32.mrb[11].mxu0  ;;  %v667_v11 = vmax.f32 %v609_v8, 0.0 }
 0x103   : > { %v534_v30 = vadd.f32 %v2209_v51, %v533_v28  ;;  %1775 = vmatprep.mubr.msk.f32.mxu1 %vm685_vm1, %v650_v24  ;;  %v1748_v37 = vpop.f32.mrb[10].mxu1  ;;  %v666_v5 = vmax.f32 %v604_v2, 0.0 }
 0x104   : > { %1776 = vmatmul.mubr.msk.f32.gmra.mrb[24].mxu1 %vm685_vm1, %v651_v26  ;;  %v653_v34 = vmax.f32 %v539_v27, 0.0  ;;  %v613_v39 = vpop.f32.mrb[11].mxu1  ;;  %v619_v12 = vadd.f32 %v1748_v37, %v2209_v51 }
 0x105   : > { %v652_v32 = vmax.f32 %v534_v30, 0.0  ;;  %v1727_v33 = vpop.f32.mrb[12].mxu0  ;;  %v614_v6 = vadd.f32 %v2209_v51, %v613_v39 }
 0x106   : > { %v549_v35 = vadd.f32 %v1727_v33, %v2209_v51  ;;  %v543_v36 = vpop.f32.mrb[13].mxu0  ;;  %v669_v15 = vmax.f32 %v619_v12, 0.0 }
 0x107   : > { %v544_v38 = vadd.f32 %v2209_v51, %v543_v36  ;;  %1778 = vmatprep.mubr.msk.f32.mxu1 %vm685_vm1, %v652_v32  ;;  %v1751_v46 = vpop.f32.mrb[12].mxu1  ;;  %v668_v9 = vmax.f32 %v614_v6, 0.0 }
 0x108   : > { %1779 = vmatmul.mubr.msk.f32.gmra.mrb[26].mxu1 %vm685_vm1, %v653_v34  ;;  %v655_v43 = vmax.f32 %v549_v35, 0.0  ;;  %v623_v48 = vpop.f32.mrb[13].mxu1  ;;  %v629_v16 = vadd.f32 %v1751_v46, %v2209_v51 }
 0x109   : > { %v654_v40 = vmax.f32 %v544_v38, 0.0  ;;  %v1730_v41 = vpop.f32.mrb[14].mxu0  ;;  %v624_v10 = vadd.f32 %v2209_v51, %v623_v48 }
 0x10a   : > { %v559_v44 = vadd.f32 %v1730_v41, %v2209_v51  ;;  %v553_v45 = vpop.f32.mrb[15].mxu0  ;;  %v671_v18 = vmax.f32 %v629_v16, 0.0 }
 0x10b   : > { %v554_v47 = vadd.f32 %v2209_v51, %v553_v45  ;;  %1781 = vmatprep.mubr.msk.f32.mxu1 %vm685_vm1, %v654_v40  ;;  %v1754_v55 = vpop.f32.mrb[14].mxu1  ;;  %v670_v13 = vmax.f32 %v624_v10, 0.0 }
 0x10c   : > { %1782 = vmatmul.mubr.msk.f32.gmra.mrb[28].mxu1 %vm685_vm1, %v655_v43  ;;  %v657_v53 = vmax.f32 %v559_v44, 0.0  ;;  %v633_v56 = vpop.f32.mrb[15].mxu1  ;;  %v639_v19 = vadd.f32 %v1754_v55, %v2209_v51 }
 0x10d   : > { %v656_v49 = vmax.f32 %v554_v47, 0.0  ;;  %v634_v14 = vadd.f32 %v2209_v51, %v633_v56 }
 0x10e   : > { %v673_v20 = vmax.f32 %v639_v19, 0.0 }
 0x10f   : > { %1784 = vmatprep.mubr.msk.f32.mxu1 %vm685_vm1, %v656_v49  ;;  %v672_v17 = vmax.f32 %v634_v14, 0.0 }
 0x110   : > { %1785 = vmatmul.mubr.msk.f32.gmra.mrb[30].mxu1 %vm685_vm1, %v657_v53 }
 0x111   : > { %1787 = vmatprep.mubr.msk.f32.mxu1 %vm685_vm1, %v658_v50 }
 0x114   : > { %1788 = vmatmul.mubr.msk.f32.gmra.mrb[32].mxu1 %vm685_vm1, %v659_v59 }
 0x115   : > { %1790 = vmatprep.mubr.msk.f32.mxu1 %vm685_vm1, %v660_v57 }
 0x118   : > { %1791 = vmatmul.mubr.msk.f32.gmra.mrb[34].mxu1 %vm685_vm1, %v661_v63 }
 0x119   : > { %1793 = vmatprep.mubr.msk.f32.mxu1 %vm685_vm1, %v662_v62 }
 0x11c   : > { %1794 = vmatmul.mubr.msk.f32.gmra.mrb[36].mxu1 %vm685_vm1, %v663_v3 }
 0x11d   : > { %1796 = vmatprep.mubr.msk.f32.mxu1 %vm685_vm1, %v664_v1 }
 0x120   : > { %1797 = vmatmul.mubr.msk.f32.gmra.mrb[38].mxu1 %vm685_vm1, %v665_v7 }
 0x121   : > { %1799 = vmatprep.mubr.msk.f32.mxu1 %vm685_vm1, %v666_v5 }
 0x124   : > { %1800 = vmatmul.mubr.msk.f32.gmra.mrb[40].mxu1 %vm685_vm1, %v667_v11 }
 0x125   : > { %1802 = vmatprep.mubr.msk.f32.mxu1 %vm685_vm1, %v668_v9 }
 0x128   : > { %1803 = vmatmul.mubr.msk.f32.gmra.mrb[42].mxu1 %vm685_vm1, %v669_v15 }
 0x129   : > { %1805 = vmatprep.mubr.msk.f32.mxu1 %vm685_vm1, %v670_v13 }
 0x12c   : > { %1806 = vmatmul.mubr.msk.f32.gmra.mrb[44].mxu1 %vm685_vm1, %v671_v18 }
 0x12d   : > { %1808 = vmatprep.mubr.msk.f32.mxu1 %vm685_vm1, %v672_v17 }
 0x130   : > { %1809 = vmatmul.mubr.msk.f32.gmra.mrb[46].mxu1 %vm685_vm1, %v673_v20 }
 0x1c7   : > { %v1765_v22 = vpop.f32.mrb[16].mxu1 }
 0x1c8   : > { %v854_v23 = vadd.f32 %v1765_v22, %v2287_v21  ;;  %v848_v24 = vpop.f32.mrb[17].mxu1 }
 0x1c9   : > { %v849_v25 = vadd.f32 %v2287_v21, %v848_v24 }
 0x1ca   : > { %v1008_v27 = vmax.f32 %v854_v23, 0.0 }
 0x1cb   : > { %v1007_v51 = vmax.f32 %v849_v25, 0.0  ;;  %v1768_v26 = vpop.f32.mrb[18].mxu1 }
 0x1cc   : > { %v864_v28 = vadd.f32 %v1768_v26, %v2287_v21  ;;  %v858_v29 = vpop.f32.mrb[19].mxu1 }
 0x1cd   : > { %v859_v30 = vadd.f32 %v2287_v21, %v858_v29  ;;  %1827 = vmatprep.mubr.msk.f32.mxu0 %vm1054_vm2, %v1007_v51 }
 0x1ce   : > { %1828 = vmatmul.mubr.msk.f32.vlgmr.msra.gmra.mrb[16].mxu0 %vm1054_vm2, %v1008_v27  ;;  %v1010_v33 = vmax.f32 %v864_v28, 0.0 }
 0x1cf   : > { %v1009_v31 = vmax.f32 %v859_v30, 0.0  ;;  %v1771_v32 = vpop.f32.mrb[20].mxu1 }
 0x1d0   : > { %v874_v34 = vadd.f32 %v1771_v32, %v2287_v21  ;;  %v868_v35 = vpop.f32.mrb[21].mxu1 }
 0x1d1   : > { %v869_v36 = vadd.f32 %v2287_v21, %v868_v35  ;;  %1830 = vmatprep.mubr.msk.f32.mxu0 %vm1054_vm2, %v1009_v31 }
 0x1d2   : > { %1831 = vmatmul.mubr.msk.f32.gmra.mrb[18].mxu0 %vm1054_vm2, %v1010_v33  ;;  %v1012_v39 = vmax.f32 %v874_v34, 0.0 }
 0x1d3   : > { %v1011_v37 = vmax.f32 %v869_v36, 0.0  ;;  %v1774_v38 = vpop.f32.mrb[22].mxu1 }
 0x1d4   : > { %v884_v40 = vadd.f32 %v1774_v38, %v2287_v21  ;;  %v878_v41 = vpop.f32.mrb[23].mxu1 }
 0x1d5   : > { %v879_v42 = vadd.f32 %v2287_v21, %v878_v41  ;;  %1833 = vmatprep.mubr.msk.f32.mxu0 %vm1054_vm2, %v1011_v37 }
 0x1d6   : > { %1834 = vmatmul.mubr.msk.f32.gmra.mrb[20].mxu0 %vm1054_vm2, %v1012_v39  ;;  %v1014_v45 = vmax.f32 %v884_v40, 0.0 }
 0x1d7   : > { %v1013_v43 = vmax.f32 %v879_v42, 0.0  ;;  %v1777_v44 = vpop.f32.mrb[24].mxu1 }
 0x1d8   : > { %v894_v46 = vadd.f32 %v1777_v44, %v2287_v21  ;;  %v888_v47 = vpop.f32.mrb[25].mxu1 }
 0x1d9   : > { %v889_v48 = vadd.f32 %v2287_v21, %v888_v47  ;;  %1836 = vmatprep.mubr.msk.f32.mxu0 %vm1054_vm2, %v1013_v43 }
 0x1da   : > { %1837 = vmatmul.mubr.msk.f32.gmra.mrb[22].mxu0 %vm1054_vm2, %v1014_v45  ;;  %v1016_v52 = vmax.f32 %v894_v46, 0.0 }
 0x1db   : > { %v1015_v49 = vmax.f32 %v889_v48, 0.0  ;;  %v1780_v50 = vpop.f32.mrb[26].mxu1 }
 0x1dc   : > { %v904_v53 = vadd.f32 %v1780_v50, %v2287_v21  ;;  %v898_v54 = vpop.f32.mrb[27].mxu1 }
 0x1dd   : > { %v899_v55 = vadd.f32 %v2287_v21, %v898_v54  ;;  %1839 = vmatprep.mubr.msk.f32.mxu0 %vm1054_vm2, %v1015_v49 }
 0x1de   : > { %1840 = vmatmul.mubr.msk.f32.gmra.mrb[24].mxu0 %vm1054_vm2, %v1016_v52  ;;  %v1018_v58 = vmax.f32 %v904_v53, 0.0 }
 0x1df   : > { %v1017_v56 = vmax.f32 %v899_v55, 0.0  ;;  %v1783_v57 = vpop.f32.mrb[28].mxu1  ;;  %v2359_v55 = vld [vmem:[%s2485_s6] ss:$0 sm:$0xff] }
 0x1e0   : > { %v914_v59 = vadd.f32 %v1783_v57, %v2287_v21  ;;  %v908_v60 = vpop.f32.mrb[29].mxu1 }
 0x1e1   : > { %v909_v62 = vadd.f32 %v2287_v21, %v908_v60  ;;  %1842 = vmatprep.mubr.msk.f32.mxu0 %vm1054_vm2, %v1017_v56 }
 0x1e2   : > { %1843 = vmatmul.mubr.msk.f32.gmra.mrb[26].mxu0 %vm1054_vm2, %v1018_v58  ;;  %v1020_v0 = vmax.f32 %v914_v59, 0.0 }
 0x1e3   : > { %v1019_v61 = vmax.f32 %v909_v62, 0.0  ;;  %v1786_v63 = vpop.f32.mrb[30].mxu1 }
 0x1e4   : > { %v924_v1 = vadd.f32 %v1786_v63, %v2287_v21  ;;  %v918_v2 = vpop.f32.mrb[31].mxu1 }
 0x1e5   : > { %v919_v3 = vadd.f32 %v2287_v21, %v918_v2  ;;  %1845 = vmatprep.mubr.msk.f32.mxu0 %vm1054_vm2, %v1019_v61 }
 0x1e6   : > { %1846 = vmatmul.mubr.msk.f32.gmra.mrb[28].mxu0 %vm1054_vm2, %v1020_v0  ;;  %v1022_v6 = vmax.f32 %v924_v1, 0.0 }
 0x1e7   : > { %v1021_v4 = vmax.f32 %v919_v3, 0.0  ;;  %v1789_v5 = vpop.f32.mrb[32].mxu1 }
 0x1e8   : > { %v934_v7 = vadd.f32 %v1789_v5, %v2287_v21  ;;  %v928_v8 = vpop.f32.mrb[33].mxu1 }
 0x1e9   : > { %v929_v9 = vadd.f32 %v2287_v21, %v928_v8  ;;  %1848 = vmatprep.mubr.msk.f32.mxu0 %vm1054_vm2, %v1021_v4 }
 0x1ea   : > { %1849 = vmatmul.mubr.msk.f32.gmra.mrb[30].mxu0 %vm1054_vm2, %v1022_v6  ;;  %v1024_v12 = vmax.f32 %v934_v7, 0.0 }
 0x1eb   : > { %v1023_v10 = vmax.f32 %v929_v9, 0.0  ;;  %v1792_v11 = vpop.f32.mrb[34].mxu1 }
 0x1ec   : > { %v944_v13 = vadd.f32 %v1792_v11, %v2287_v21  ;;  %v938_v14 = vpop.f32.mrb[35].mxu1 }
 0x1ed   : > { %v939_v15 = vadd.f32 %v2287_v21, %v938_v14  ;;  %1851 = vmatprep.mubr.msk.f32.mxu0 %vm1054_vm2, %v1023_v10 }
 0x1ee   : > { %1852 = vmatmul.mubr.msk.f32.gmra.mrb[32].mxu0 %vm1054_vm2, %v1024_v12  ;;  %v1026_v18 = vmax.f32 %v944_v13, 0.0 }
 0x1ef   : > { %v1025_v16 = vmax.f32 %v939_v15, 0.0  ;;  %v1795_v17 = vpop.f32.mrb[36].mxu1 }
 0x1f0   : > { %v954_v19 = vadd.f32 %v1795_v17, %v2287_v21  ;;  %v948_v20 = vpop.f32.mrb[37].mxu1 }
 0x1f1   : > { %v949_v22 = vadd.f32 %v2287_v21, %v948_v20  ;;  %1854 = vmatprep.mubr.msk.f32.mxu0 %vm1054_vm2, %v1025_v16 }
 0x1f2   : > { %1855 = vmatmul.mubr.msk.f32.gmra.mrb[34].mxu0 %vm1054_vm2, %v1026_v18  ;;  %v1028_v25 = vmax.f32 %v954_v19, 0.0 }
 0x1f3   : > { %v1027_v23 = vmax.f32 %v949_v22, 0.0  ;;  %v1798_v24 = vpop.f32.mrb[38].mxu1 }
 0x1f4   : > { %v964_v51 = vadd.f32 %v1798_v24, %v2287_v21  ;;  %v958_v26 = vpop.f32.mrb[39].mxu1 }
 0x1f5   : > { %v959_v27 = vadd.f32 %v2287_v21, %v958_v26  ;;  %1857 = vmatprep.mubr.msk.f32.mxu0 %vm1054_vm2, %v1027_v23 }
 0x1f6   : > { %1858 = vmatmul.mubr.msk.f32.gmra.mrb[36].mxu0 %vm1054_vm2, %v1028_v25  ;;  %v1030_v30 = vmax.f32 %v964_v51, 0.0 }
 0x1f7   : > { %v1029_v28 = vmax.f32 %v959_v27, 0.0  ;;  %v1801_v29 = vpop.f32.mrb[40].mxu1 }
 0x1f8   : > { %v974_v31 = vadd.f32 %v1801_v29, %v2287_v21  ;;  %v968_v32 = vpop.f32.mrb[41].mxu1 }
 0x1f9   : > { %v969_v33 = vadd.f32 %v2287_v21, %v968_v32  ;;  %1860 = vmatprep.mubr.msk.f32.mxu0 %vm1054_vm2, %v1029_v28 }
 0x1fa   : > { %1861 = vmatmul.mubr.msk.f32.gmra.mrb[38].mxu0 %vm1054_vm2, %v1030_v30  ;;  %v1032_v36 = vmax.f32 %v974_v31, 0.0 }
 0x1fb   : > { %v1031_v34 = vmax.f32 %v969_v33, 0.0  ;;  %v1804_v35 = vpop.f32.mrb[42].mxu1 }
 0x1fc   : > { %v984_v37 = vadd.f32 %v1804_v35, %v2287_v21  ;;  %v978_v38 = vpop.f32.mrb[43].mxu1 }
 0x1fd   : > { %v979_v39 = vadd.f32 %v2287_v21, %v978_v38  ;;  %1863 = vmatprep.mubr.msk.f32.mxu0 %vm1054_vm2, %v1031_v34 }
 0x1fe   : > { %1864 = vmatmul.mubr.msk.f32.gmra.mrb[40].mxu0 %vm1054_vm2, %v1032_v36  ;;  %v1034_v42 = vmax.f32 %v984_v37, 0.0 }
 0x1ff   : > { %v1033_v40 = vmax.f32 %v979_v39, 0.0  ;;  %v1807_v41 = vpop.f32.mrb[44].mxu1 }
 0x200   : > { %v994_v43 = vadd.f32 %v1807_v41, %v2287_v21  ;;  %v988_v44 = vpop.f32.mrb[45].mxu1 }
 0x201   : > { %v989_v45 = vadd.f32 %v2287_v21, %v988_v44  ;;  %1866 = vmatprep.mubr.msk.f32.mxu0 %vm1054_vm2, %v1033_v40 }
 0x202   : > { %1867 = vmatmul.mubr.msk.f32.gmra.mrb[42].mxu0 %vm1054_vm2, %v1034_v42  ;;  %v1036_v48 = vmax.f32 %v994_v43, 0.0 }
 0x203   : > { %v1035_v46 = vmax.f32 %v989_v45, 0.0  ;;  %v1810_v47 = vpop.f32.mrb[46].mxu1 }
 0x204   : > { %v1004_v49 = vadd.f32 %v1810_v47, %v2287_v21  ;;  %v998_v50 = vpop.f32.mrb[47].mxu1 }
 0x205   : > { %v999_v52 = vadd.f32 %v2287_v21, %v998_v50  ;;  %1869 = vmatprep.mubr.msk.f32.mxu0 %vm1054_vm2, %v1035_v46 }
 0x206   : > { %1870 = vmatmul.mubr.msk.f32.gmra.mrb[44].mxu0 %vm1054_vm2, %v1036_v48  ;;  %v1038_v54 = vmax.f32 %v1004_v49, 0.0 }
 0x207   : > { %v1037_v53 = vmax.f32 %v999_v52, 0.0 }
 0x209   : > { %1872 = vmatprep.mubr.msk.f32.mxu0 %vm1054_vm2, %v1037_v53 }
 0x20a   : > { %1873 = vmatmul.mubr.msk.f32.gmra.mrb[46].mxu0 %vm1054_vm2, %v1038_v54 }
 0x2a1   : > { %v1829_v56 = vpop.f32.mrb[16].mxu0 }
 0x2a2   : > { %v1223_v21 = vadd.f32 %v1829_v56, %v2359_v55  ;;  %v1217_v57 = vpop.f32.mrb[17].mxu0 }
 0x2a3   : > { %v1218_v58 = vadd.f32 %v2359_v55, %v1217_v57 }
 0x2a4   : > { %1377 = vst [vmem:[%s2363_s29 + $0x8] sm:$0xff] %v1223_v21 }
 0x2a5   : > { %1376 = vst [vmem:[%s2363_s29] sm:$0xff] %v1218_v58  ;;  %v1832_v59 = vpop.f32.mrb[18].mxu0 }
 0x2a6   : > { %v1233_v60 = vadd.f32 %v1832_v59, %v2359_v55  ;;  %v1227_v62 = vpop.f32.mrb[19].mxu0 }
 0x2a7   : > { %v1228_v61 = vadd.f32 %v2359_v55, %v1227_v62 }
 0x2a8   : > { %1379 = vst [vmem:[%s2363_s29 + $0x18] sm:$0xff] %v1233_v60 }
 0x2a9   : > { %1378 = vst [vmem:[%s2363_s29 + $0x10] sm:$0xff] %v1228_v61  ;;  %v1835_v63 = vpop.f32.mrb[20].mxu0 }
 0x2aa   : > { %v1243_v0 = vadd.f32 %v1835_v63, %v2359_v55  ;;  %v1237_v1 = vpop.f32.mrb[21].mxu0 }
 0x2ab   : > { %v1238_v2 = vadd.f32 %v2359_v55, %v1237_v1 }
 0x2ac   : > { %1381 = vst [vmem:[%s2363_s29 + $0x28] sm:$0xff] %v1243_v0 }
 0x2ad   : > { %1380 = vst [vmem:[%s2363_s29 + $0x20] sm:$0xff] %v1238_v2  ;;  %v1838_v3 = vpop.f32.mrb[22].mxu0 }
 0x2ae   : > { %v1253_v4 = vadd.f32 %v1838_v3, %v2359_v55  ;;  %v1247_v5 = vpop.f32.mrb[23].mxu0 }
 0x2af   : > { %v1248_v6 = vadd.f32 %v2359_v55, %v1247_v5 }
 0x2b0   : > { %1383 = vst [vmem:[%s2363_s29 + $0x38] sm:$0xff] %v1253_v4 }
 0x2b1   : > { %1382 = vst [vmem:[%s2363_s29 + $0x30] sm:$0xff] %v1248_v6  ;;  %v1841_v7 = vpop.f32.mrb[24].mxu0 }
 0x2b2   : > { %v1263_v8 = vadd.f32 %v1841_v7, %v2359_v55  ;;  %v1257_v9 = vpop.f32.mrb[25].mxu0 }
 0x2b3   : > { %v1258_v10 = vadd.f32 %v2359_v55, %v1257_v9 }
 0x2b4   : > { %1385 = vst [vmem:[%s2363_s29 + $0x48] sm:$0xff] %v1263_v8 }
 0x2b5   : > { %1384 = vst [vmem:[%s2363_s29 + $0x40] sm:$0xff] %v1258_v10  ;;  %v1844_v11 = vpop.f32.mrb[26].mxu0 }
 0x2b6   : > { %v1273_v12 = vadd.f32 %v1844_v11, %v2359_v55  ;;  %v1267_v13 = vpop.f32.mrb[27].mxu0 }
 0x2b7   : > { %v1268_v14 = vadd.f32 %v2359_v55, %v1267_v13 }
 0x2b8   : > { %1387 = vst [vmem:[%s2363_s29 + $0x58] sm:$0xff] %v1273_v12 }
 0x2b9   : > { %1386 = vst [vmem:[%s2363_s29 + $0x50] sm:$0xff] %v1268_v14  ;;  %v1847_v15 = vpop.f32.mrb[28].mxu0 }
 0x2ba   : > { %v1283_v16 = vadd.f32 %v1847_v15, %v2359_v55  ;;  %v1277_v17 = vpop.f32.mrb[29].mxu0 }
 0x2bb   : > { %v1278_v18 = vadd.f32 %v2359_v55, %v1277_v17 }
 0x2bc   : > { %1389 = vst [vmem:[%s2363_s29 + $0x68] sm:$0xff] %v1283_v16 }
 0x2bd   : > { %1388 = vst [vmem:[%s2363_s29 + $0x60] sm:$0xff] %v1278_v18  ;;  %v1850_v19 = vpop.f32.mrb[30].mxu0 }
 0x2be   : > { %v1293_v20 = vadd.f32 %v1850_v19, %v2359_v55  ;;  %v1287_v22 = vpop.f32.mrb[31].mxu0 }
 0x2bf   : > { %v1288_v23 = vadd.f32 %v2359_v55, %v1287_v22 }
 0x2c0   : > { %1391 = vst [vmem:[%s2363_s29 + $0x78] sm:$0xff] %v1293_v20 }
 0x2c1   : > { %1390 = vst [vmem:[%s2363_s29 + $0x70] sm:$0xff] %v1288_v23  ;;  %v1853_v24 = vpop.f32.mrb[32].mxu0 }
 0x2c2   : > { %v1303_v25 = vadd.f32 %v1853_v24, %v2359_v55  ;;  %v1297_v51 = vpop.f32.mrb[33].mxu0 }
 0x2c3   : > { %v1298_v26 = vadd.f32 %v2359_v55, %v1297_v51 }
 0x2c4   : > { %1393 = vst [vmem:[%s2363_s29 + $0x88] sm:$0xff] %v1303_v25 }
 0x2c5   : > { %1392 = vst [vmem:[%s2363_s29 + $0x80] sm:$0xff] %v1298_v26  ;;  %v1856_v27 = vpop.f32.mrb[34].mxu0 }
 0x2c6   : > { %v1313_v28 = vadd.f32 %v1856_v27, %v2359_v55  ;;  %v1307_v29 = vpop.f32.mrb[35].mxu0 }
 0x2c7   : > { %v1308_v30 = vadd.f32 %v2359_v55, %v1307_v29 }
 0x2c8   : > { %1395 = vst [vmem:[%s2363_s29 + $0x98] sm:$0xff] %v1313_v28 }
 0x2c9   : > { %1394 = vst [vmem:[%s2363_s29 + $0x90] sm:$0xff] %v1308_v30  ;;  %v1859_v31 = vpop.f32.mrb[36].mxu0 }
 0x2ca   : > { %v1323_v32 = vadd.f32 %v1859_v31, %v2359_v55  ;;  %v1317_v33 = vpop.f32.mrb[37].mxu0 }
 0x2cb   : > { %v1318_v34 = vadd.f32 %v2359_v55, %v1317_v33 }
 0x2cc   : > { %1397 = vst [vmem:[%s2363_s29 + $0xa8] sm:$0xff] %v1323_v32 }
 0x2cd   : > { %1396 = vst [vmem:[%s2363_s29 + $0xa0] sm:$0xff] %v1318_v34  ;;  %v1862_v35 = vpop.f32.mrb[38].mxu0 }
 0x2ce   : > { %v1333_v36 = vadd.f32 %v1862_v35, %v2359_v55  ;;  %v1327_v37 = vpop.f32.mrb[39].mxu0 }
 0x2cf   : > { %v1328_v38 = vadd.f32 %v2359_v55, %v1327_v37 }
 0x2d0   : > { %1399 = vst [vmem:[%s2363_s29 + $0xb8] sm:$0xff] %v1333_v36 }
 0x2d1   : > { %1398 = vst [vmem:[%s2363_s29 + $0xb0] sm:$0xff] %v1328_v38  ;;  %v1865_v39 = vpop.f32.mrb[40].mxu0 }
 0x2d2   : > { %v1343_v40 = vadd.f32 %v1865_v39, %v2359_v55  ;;  %v1337_v41 = vpop.f32.mrb[41].mxu0 }
 0x2d3   : > { %v1338_v42 = vadd.f32 %v2359_v55, %v1337_v41 }
 0x2d4   : > { %1401 = vst [vmem:[%s2363_s29 + $0xc8] sm:$0xff] %v1343_v40 }
 0x2d5   : > { %1400 = vst [vmem:[%s2363_s29 + $0xc0] sm:$0xff] %v1338_v42  ;;  %v1868_v43 = vpop.f32.mrb[42].mxu0 }
 0x2d6   : > { %v1353_v44 = vadd.f32 %v1868_v43, %v2359_v55  ;;  %v1347_v45 = vpop.f32.mrb[43].mxu0 }
 0x2d7   : > { %v1348_v46 = vadd.f32 %v2359_v55, %v1347_v45 }
 0x2d8   : > { %1403 = vst [vmem:[%s2363_s29 + $0xd8] sm:$0xff] %v1353_v44 }
 0x2d9   : > { %1402 = vst [vmem:[%s2363_s29 + $0xd0] sm:$0xff] %v1348_v46  ;;  %v1871_v47 = vpop.f32.mrb[44].mxu0 }
 0x2da   : > { %v1363_v48 = vadd.f32 %v1871_v47, %v2359_v55  ;;  %v1357_v49 = vpop.f32.mrb[45].mxu0 }
 0x2db   : > { %v1358_v50 = vadd.f32 %v2359_v55, %v1357_v49 }
 0x2dc   : > { %1405 = vst [vmem:[%s2363_s29 + $0xe8] sm:$0xff] %v1363_v48 }
 0x2dd   : > { %1404 = vst [vmem:[%s2363_s29 + $0xe0] sm:$0xff] %v1358_v50  ;;  %v1874_v52 = vpop.f32.mrb[46].mxu0 }
 0x2de   : > { %v1373_v53 = vadd.f32 %v1874_v52, %v2359_v55  ;;  %v1367_v54 = vpop.f32.mrb[47].mxu0 }
 0x2df   : > { %v1368_v56 = vadd.f32 %v2359_v55, %v1367_v54 }
 0x2e0   : > { %1407 = vst [vmem:[%s2363_s29 + $0xf8] sm:$0xff] %v1373_v53 }
 0x2e1   : > { %1406 = vst [vmem:[%s2363_s29 + $0xf0] sm:$0xff] %v1368_v56 }
 0x2e2   : > { %1955 = shalt.err (!%p1952_p3)
}
 0x2e3   : > { %s1956_s20 = scalar_lea.hbm %s2429_s15, 4096  ;;  %s1960_s23 = scalar_lea.hbm %s2486_s7, 8192 }
 0x2e4   : > { %p1957_p4 = scmp.ne.s32.totalorder %s2429_s15, %s1956_s20  ;;  %p1961_p9 = scmp.lt.u32.totalorder %s2429_s15, %s2486_s7 }
 0x2e5   : > { %p1962_p10 = scmp.lt.u32.totalorder %s1960_s23, %s1956_s20  ;;  %p1964_p12 = scmp.lt.u32.totalorder %s1956_s20, %s2429_s15 }
 0x2e6   : > { %p1958_p7 = pnand %p1957_p4, %p2087_p5 }
 0x2e7   : > { %p1963_p11 = por %p1962_p10, %p1961_p9 }
 0x2e8   : > { %p1959_p8 = pneg %p1958_p7 }
 0x2e9   : > { %p1965_p13 = por %p1964_p12, %p1963_p11 }
 0x2eb   : > { %p1966_p0 = pnand %p1965_p13, %p1959_p8 }
 0x2ed   : > { %1969 = shalt.err (!%p1966_p0)
}
 0x2ee   : > { %s2007_s13 = smov 128   ;;  %s2008_s14 = smov 8  }
 0x2ef   : > { %1901 = dma.vmem_to_hbm [thread:$0]  (%p2087_p5), %s2431_s9, 4096, %s2429_s15, %s2438_s28, %s2007_s13, %s2007_s13, %s2008_s14  }
 0x2f0 PF: > { %p1907_p1 = scmp.ge.s32.totalorder %s2004_s27, 2  ;;  %s1437_s16 = sand.u32 1, %s1992_s24  }
 0x2f1   : > { %s1438_s17 = scalar_lea.sflag [#allocation3], %s1437_s16 }
 0x2f2   : > { %p1904_p2 = pnand %p1907_p1, %p2091_p6 }
 0x2f4   : > { %1987 = dma.done.wait (!%p1904_p2), %s1438_s17, 4096  }
 0x2f5   : > { %1989 = vsyncadd (!%p1904_p2), %s1438_s17, 4294963200  ;;  %p17_p3 = scmp.ge.s32.totalorder %s2074_s30, 4   ;;  %s2489_s24 = smov %s1996_s25 }
 0x2f6   : > { %s2490_s25 = smov %s2000_s26  ;;  %s2491_s26 = smov %s2085_s10 }
 0x2f7   : > { %s2492_s27 = smov %s2074_s30  ;;  %19 = sbr.rel (!%p17_p3) target bundleno = 3 (0x3), region = 83 }
 0x2fe   :  { %1443 = vsyncpa [#allocation3], 1 }
 0x2ff   :  { %1445 = vsyncpa [#allocation3 + $0x1], 1 }

</bundles_post_ra>
